<compile_context>
chip_gen: v7x
topology: tpu7x:2x2x1
jax: 0.10.0
libtpu: 0.0.40
codegen_flags: <defaults>
</compile_context>

<pallas_src>
import jax
import jax.numpy as jnp
from jax.experimental import pallas as pl
from jax.experimental.pallas import tpu as pltpu


def _round_up(v: int, m: int) -> int:
    return (v + m - 1) // m * m


# ----------------------------------------------------------------------------
# Pallas kernel: one (batch, T-tile) step of the VQ hot path, channel-major.
#   x_ref     : (1, D, m)       input activations (native dtype)
#   kd_ref    : (K_pad, D)      distance codebook (bf16 fast path), VMEM-resident
#   kq_ref    : (K_pad, D)      dequant codebook (full precision), VMEM-resident
#   ksq_ref   : (K_pad, 1)      |k|^2 with padded-bin 1e30 sentinel, VMEM-resident
#   xl_ref    : (1, 1, m)       int32 latent codes
#   xd_ref    : (1, D, m)       dequantised / straight-through output (input dtype)
#   stats_ref : (1, 1, 1, 128)  per-tile scalar partials: [fit(=commit), sum_x, sum_x2]
# ----------------------------------------------------------------------------
def _vq_kernel(x_ref, kd_ref, kq_ref, ksq_ref, xl_ref, xd_ref, stats_ref):
    k_pad = kd_ref.shape[0]

    x_nat = x_ref[0]                                   # (D, m)
    x_f32 = x_nat.astype(jnp.float32)
    x_mxu = x_nat.astype(kd_ref.dtype)                 # per-tile cast only

    # Squared distances without the argmin-invariant |x|^2 term:
    #   d'[b, t] = |k_b|^2 - 2 <k_b, x_t>   (codebook norm hoisted to the wrapper;
    # padded bins carry a 1e30 sentinel so they can never win the argmin).
    kx = jnp.dot(kd_ref[...], x_mxu, preferred_element_type=jnp.float32)   # (K_pad, m)
    dist = ksq_ref[...] - 2.0 * kx                                         # (K_pad, m)

    # argmin with torch.min tie-break (lowest index); a single masked pass feeds both
    # the code ids and the one-hot used by the dequant matmul.
    min_d = jnp.min(dist, axis=0, keepdims=True)                           # (1, m)
    ids = jax.lax.broadcasted_iota(jnp.int32, dist.shape, 0)               # (K_pad, m)
    masked = jnp.where(dist == min_d, ids, k_pad)                          # (K_pad, m)
    x_l = jnp.min(masked, axis=0, keepdims=True)                           # (1, m) int32
    onehot = (masked == x_l).astype(kq_ref.dtype)                          # (K_pad, m)

    # dequantise: exact gather of codebook rows via one-hot matmul (full-precision k)
    x_d = jax.lax.dot_general(kq_ref[...], onehot, (((0,), (0,)), ((), ())),
                              preferred_element_type=jnp.float32)          # (D, m)

    xl_ref[0] = x_l
    xd_ref[0] = x_d.astype(xd_ref.dtype)

    # fused scalar partials (finished in the JAX wrapper).  s_fit doubles as the
    # commit partial: ||x_d - x||^2 == min distance == min_d + |x|^2.
    x_sq_cols = jnp.sum(x_f32 * x_f32, axis=0, keepdims=True)              # (1, m)
    s_fit = jnp.sum(min_d + x_sq_cols)
    s_x = jnp.sum(x_f32)                      # prenorm mean term
    s_xx = jnp.sum(x_sq_cols)                 # prenorm norm term

    lane = jax.lax.broadcasted_iota(jnp.int32, stats_ref.shape, 3)
    stats_ref[...] = (jnp.where(lane == 0, s_fit, 0.0)
                      + jnp.where(lane == 1, s_x, 0.0)
                      + jnp.where(lane == 2, s_xx, 0.0))


# ----------------------------------------------------------------------------
# Generation-aware VMEM sizing and tile selection
# ----------------------------------------------------------------------------
def _vmem_budget_bytes():
    """Return (tile budget, vmem_limit_bytes).  ~96/100 MiB on 128-MiB parts
    (v5e/v6e), 40/48 MiB on v7x (64 MiB per TC) and on unknown hardware."""
    cap = None
    try:
        cap = getattr(pltpu.get_tpu_info(), "vmem_capacity_bytes", None)
    except Exception:
        cap = None
    if cap is None:
        try:
            kind = jax.devices()[0].device_kind.lower()
            if any(t in kind for t in ("v5e", "v5 lite", "v5litepod", "v6e", "v6 lite", "v6")):
                cap = 128 * 1024 * 1024
            else:
                cap = 64 * 1024 * 1024          # conservative (v7x per-TC)
        except Exception:
            cap = 64 * 1024 * 1024
    if cap >= 100 * 1024 * 1024:
        return 96 * 1024 * 1024, 100 * 1024 * 1024
    return 40 * 1024 * 1024, 48 * 1024 * 1024


def _pick_tile_t(T, k_pad, d, x_itemsize, vmem_budget):
    """Largest lane-aligned T tile whose working set honestly fits the VMEM budget."""
    # live (K_pad, m) intermediates per column: kx + dist (f32), ids + masked (i32),
    # onehot (<= f32) -> ~5 * K_pad * 4 bytes; plus double-buffered x / x_d tiles and
    # the in-kernel f32 copy of x.
    per_col = 5 * k_pad * 4 + 4 * d * max(int(x_itemsize), 2) + d * 4
    # fixed resident cost: dist + dequant codebooks (double-buffered, <= f32), |k|^2,
    # plus ~1 MiB slack for compiler-internal scratch.
    fixed = 4 * k_pad * d * 4 + 2 * k_pad * 4 + (1 << 20)
    cap_cols = max(128, (vmem_budget - fixed) // max(per_col, 1))
    target = 2048 if vmem_budget >= 80 * 1024 * 1024 else 512
    limit = min(target, cap_cols)
    if T <= limit:
        return T                 # whole-T block (always layout-legal)
    best = None
    t = 128
    while t <= min(limit, T):
        if T % t == 0:
            best = t
        t += 128
    if best is not None:
        return best
    if fixed + T * per_col <= vmem_budget:
        return T                 # whole-T block still fits the budget
    raise ValueError(
        f"T={T} has no 128-aligned divisor <= {limit} and a whole-T block would "
        f"exceed the VMEM budget; pad T to a multiple of 128 before calling.")


def _vq_pallas(x, k_dist, k_deq, k_sq, tile_t, vmem_limit_bytes):
    N, D, T = x.shape
    K_pad, Dk = k_dist.shape
    assert Dk == D
    assert T % tile_t == 0, (T, tile_t)
    assert tile_t == T or tile_t % 128 == 0, "T tiles must be lane-aligned or span T"
    num_t = T // tile_t

    # advisory cost estimate for XLA scheduling around the custom call
    flops = 4 * N * T * K_pad * D                                 # two matmuls
    bytes_accessed = (2 * N * D * T * x.dtype.itemsize            # x in + x_d out
                      + K_pad * D * (k_dist.dtype.itemsize + k_deq.dtype.itemsize)
                      + K_pad * 4                                 # |k|^2
                      + N * T * 4                                 # codes
                      + N * num_t * 128 * 4)                      # stats partials

    return pl.pallas_call(
        _vq_kernel,
        out_shape=(
            jax.ShapeDtypeStruct((N, 1, T), jnp.int32),              # latent codes
            jax.ShapeDtypeStruct((N, D, T), x.dtype),                # straight-through x_d
            jax.ShapeDtypeStruct((N, num_t, 1, 128), jnp.float32),   # fused reductions
        ),
        grid_spec=pltpu.PrefetchScalarGridSpec(
            num_scalar_prefetch=0,
            grid=(N, num_t),
            in_specs=[
                pl.BlockSpec((1, D, tile_t), lambda n, t: (n, 0, t)),
                pl.BlockSpec((K_pad, D), lambda n, t: (0, 0)),   # resident dist codebook
                pl.BlockSpec((K_pad, D), lambda n, t: (0, 0)),   # resident dequant codebook
                pl.BlockSpec((K_pad, 1), lambda n, t: (0, 0)),   # resident |k|^2 (+sentinel)
            ],
            out_specs=(
                pl.BlockSpec((1, 1, tile_t), lambda n, t: (n, 0, t)),
                pl.BlockSpec((1, D, tile_t), lambda n, t: (n, 0, t)),
                pl.BlockSpec((1, 1, 1, 128), lambda n, t: (n, t, 0, 0)),
            ),
        ),
        compiler_params=pltpu.CompilerParams(
            # TODO(synk): on v7x verify via xprof that both TensorCores are active; if
            #             not, split the leading grid axis explicitly (CORE_PARALLEL).
            dimension_semantics=("parallel", "parallel"),
            vmem_limit_bytes=vmem_limit_bytes,
        ),
        cost_estimate=pl.CostEstimate(
            flops=flops, transcendentals=0, bytes_accessed=bytes_accessed),
    )(x, k_dist, k_deq, k_sq)


# ----------------------------------------------------------------------------
# BottleneckBlock.forward (eval mode) — glue around the kernel
# ----------------------------------------------------------------------------
def bottleneck_block_forward(x, k, tile_t=None, use_bf16_dist=True):
    # x: (N, C, T), C == emb_width ;  k: (k_bins, emb_width)
    N, C, T = x.shape
    K, D = k.shape
    assert C == D, f"expected channel dim {C} == emb_width {D}"
    # TODO(synk): the preprocess branch for channels == 2*emb_width (split + sum halves)
    #             is not implemented; only the C == emb_width path is supported.

    # pad codebook rows to MXU/vreg-friendly multiples (128 for production-size
    # codebooks, a sublane multiple otherwise); padded bins are masked via the
    # |k|^2 sentinel so they never win the argmin.
    if K >= 512:
        K_pad = _round_up(K, 128)
    else:
        sub = 16 if (x.dtype == jnp.bfloat16 or k.dtype == jnp.bfloat16) else 8
        K_pad = max(_round_up(K, sub), sub)
    k_p = k if K_pad == K else jnp.concatenate(
        [k, jnp.zeros((K_pad - K, D), k.dtype)], axis=0)

    # hoisted codebook norm (+ sentinel) — the kernel never recomputes codebook work.
    k_f32 = k_p.astype(jnp.float32)
    k_sq = jnp.sum(k_f32 * k_f32, axis=-1, keepdims=True)
    if K_pad != K:
        rows = jax.lax.broadcasted_iota(jnp.int32, (K_pad, 1), 0)
        k_sq = jnp.where(rows < K, k_sq, jnp.float32(1e30))

    # distance matmul feeds the MXU in bf16 (full-rate on all generations); the
    # one-hot dequant matmul keeps full source precision so x_d == k[x_l] exactly.
    # Documented tolerance: near-tie codes and the fit metric inherit bf16 precision.
    if x.dtype == jnp.bfloat16:
        k_dist = k_p.astype(jnp.bfloat16)
        k_deq = k_dist
    elif use_bf16_dist:
        k_dist = k_p.astype(jnp.bfloat16)
        k_deq = k_f32
    else:
        k_dist = k_f32
        k_deq = k_f32

    vmem_budget, vmem_limit = _vmem_budget_bytes()
    if tile_t is None:
        tile_t = _pick_tile_t(T, K_pad, D, x.dtype.itemsize, vmem_budget)

    x_l3, x_d, stats = _vq_pallas(x, k_dist, k_deq, k_sq, tile_t, vmem_limit)

    M = N * T
    numel = float(M * D)
    s_fit = jnp.sum(stats[..., 0])
    s_x = jnp.sum(stats[..., 1])
    s_xx = jnp.sum(stats[..., 2])

    fit = s_fit / M
    commit_loss = s_fit / numel          # ||x_d - x||^2 / numel  (x_d is the argmin row)
    # ||x - mean(x)||_F / sqrt(numel) from single-pass f32 sums; documented tolerance
    # (single-pass cancellation only bites when mean >> std; guarded non-negative).
    prenorm = jnp.sqrt(jnp.maximum(s_xx - s_x * s_x / numel, 0.0)) / jnp.sqrt(numel)

    # straight-through fwd value of x + (x_d - x).detach() == x_d ; already NCW layout
    x_l = x_l3.reshape(N, T)
    return x_l, x_d, commit_loss, dict(fit=fit, pn=prenorm)


# ----------------------------------------------------------------------------
# Bottleneck.forward (eval mode): apply one block per level
# ----------------------------------------------------------------------------
def bottleneck_forward(xs, ks, tile_t=None):
    zs, xs_quantised, commit_losses, metrics = [], [], [], []
    for x, k in zip(xs, ks):
        z, x_q, c, _m = bottleneck_block_forward(x, k, tile_t=tile_t)
        zs.append(z)
        xs_quantised.append(x_q)       # not training -> detached (no-op in JAX)
        commit_losses.append(c)
        # not training -> metrics list stays empty (matches the PyTorch forward)
    # TODO(synk): training-time paths (init_k / update_k EMA with dist.* collectives)
    #             are not part of the eval forward and are not implemented.
    return zs, xs_quantised, commit_losses, metrics


if __name__ == "__main__":
    import numpy as np

    # synthetic config (mirrors the F0VQConfig fields used by the module)
    levels = 2
    k_bins = 16
    emb_dim = 32
    N, T = 2, 256
    tile_t = 128      # two lane-aligned T tiles per batch row -> grid (N, 2)

    key = jax.random.PRNGKey(0)
    ks, xs = [], []
    for _ in range(levels):
        key, kk, kx = jax.random.split(key, 3)
        # deterministic synthetic codebook (stand-in for the `k` buffer after init_k)
        ks.append(jax.random.normal(kk, (k_bins, emb_dim), dtype=jnp.float32))
        xs.append(jax.random.normal(kx, (N, emb_dim, T), dtype=jnp.float32))

    zs, xs_q, commits, metrics = bottleneck_forward(xs, ks, tile_t=tile_t)
    jax.block_until_ready((zs, xs_q, commits))

    # silent correctness check against a float64 numpy reference
    for lvl in range(levels):
        x_np = np.asarray(xs[lvl], dtype=np.float64)
        k_np = np.asarray(ks[lvl], dtype=np.float64)
        xf = np.transpose(x_np, (0, 2, 1)).reshape(-1, emb_dim)          # (M, D)
        d_ref = ((xf ** 2).sum(-1, keepdims=True) - 2.0 * xf @ k_np.T
                 + (k_np ** 2).sum(-1)[None, :])
        min_ref = d_ref.min(-1)
        z_ref = d_ref.argmin(-1)

        z_ker = np.asarray(zs[lvl]).reshape(-1)
        # kernel codes must be near-optimal; the bf16 distance matmul may flip
        # near-ties, so the allowed gap is relative to the distance scale.
        gap = d_ref[np.arange(xf.shape[0]), z_ker] - min_ref
        assert (gap <= 1e-3 + 1e-2 * np.abs(min_ref)).all()

        # dequantised output == selected codebook rows (exact), already (N, C, T)
        xq = np.asarray(xs_q[lvl])
        xq_flat = np.transpose(xq, (0, 2, 1)).reshape(-1, emb_dim)
        assert np.allclose(xq_flat, np.asarray(ks[lvl])[z_ker], atol=1e-5, rtol=1e-5)

        # scalar losses / metrics
        commit_ref = ((k_np[z_ref] - xf) ** 2).sum() / xf.size
        fit_ref = min_ref.mean()
        pn_ref = np.linalg.norm(xf - xf.mean()) / np.sqrt(xf.size)
        assert np.allclose(float(commits[lvl]), commit_ref, atol=1e-3, rtol=1e-3)

        _, _, _, met = bottleneck_block_forward(xs[lvl], ks[lvl], tile_t=tile_t)
        assert np.allclose(float(met["fit"]), fit_ref, atol=1e-2, rtol=1e-2)
        assert np.allclose(float(met["pn"]), pn_ref, atol=1e-2, rtol=1e-2)

    print("KERNEL_OK")
</pallas_src>

<mosaic_0001>
module attributes {stable_mosaic.version = 11 : i64} {
  func.func @_vq_kernel(%arg0: i32, %arg1: i32, %arg2: memref<1x32x128xf32, #tpu.memory_space<vmem>>, %arg3: memref<16x32xbf16, #tpu.memory_space<vmem>>, %arg4: memref<16x32xf32, #tpu.memory_space<vmem>>, %arg5: memref<16x1xf32, #tpu.memory_space<vmem>>, %arg6: memref<1x1x128xi32, #tpu.memory_space<vmem>>, %arg7: memref<1x32x128xf32, #tpu.memory_space<vmem>>, %arg8: memref<1x1x1x128xf32, #tpu.memory_space<vmem>>) attributes {dimension_semantics = [#tpu.dimension_semantics<parallel>, #tpu.dimension_semantics<parallel>], iteration_bounds = array<i64: 2, 2>, scalar_prefetch = 0 : i64, scratch_operands = 0 : i64, tpu.core_type = #tpu.core_type<tc>, window_params = [{transform_indices = @transform_0, window_bounds = array<i64: 1, 32, 128>}, {pipeline_mode = #tpu.pipeline_mode<synchronous>, transform_indices = @transform_1, window_bounds = array<i64: 16, 32>}, {pipeline_mode = #tpu.pipeline_mode<synchronous>, transform_indices = @transform_2, window_bounds = array<i64: 16, 32>}, {pipeline_mode = #tpu.pipeline_mode<synchronous>, transform_indices = @transform_3, window_bounds = array<i64: 16, 1>}, {transform_indices = @transform_4, window_bounds = array<i64: 1, 1, 128>}, {transform_indices = @transform_5, window_bounds = array<i64: 1, 32, 128>}, {transform_indices = @transform_6, window_bounds = array<i64: 1, 1, 1, 128>}]} {
    %c0 = arith.constant 0 : index
    %c0_0 = arith.constant 0 : index
    %c0_1 = arith.constant 0 : index
    %0 = vector.load %arg2[%c0, %c0_0, %c0_1] : memref<1x32x128xf32, #tpu.memory_space<vmem>>, vector<1x32x128xf32>
    %1 = vector.shape_cast %0 : vector<1x32x128xf32> to vector<32x128xf32>
    %2 = arith.truncf %1 : vector<32x128xf32> to vector<32x128xbf16>
    %c0_2 = arith.constant 0 : index
    %c0_3 = arith.constant 0 : index
    %3 = vector.load %arg3[%c0_2, %c0_3] : memref<16x32xbf16, #tpu.memory_space<vmem>>, vector<16x32xbf16>
    %cst = arith.constant dense<0.000000e+00> : vector<16x128xf32>
    %4 = tpu.matmul %3, %2, %cst {dimension_numbers = #tpu.dot_dimension_numbers<[1], [0], [0], [1], [0, 0, 1, 1], [], []>} : vector<16x32xbf16>, vector<32x128xbf16>, vector<16x128xf32> -> vector<16x128xf32>
    %c0_4 = arith.constant 0 : index
    %c0_5 = arith.constant 0 : index
    %5 = vector.load %arg5[%c0_4, %c0_5] : memref<16x1xf32, #tpu.memory_space<vmem>>, vector<16x1xf32>
    %cst_6 = arith.constant 2.000000e+00 : f32
    %6 = vector.broadcast %cst_6 : f32 to vector<16x128xf32>
    %7 = arith.mulf %6, %4 : vector<16x128xf32>
    %8 = vector.broadcast %5 : vector<16x1xf32> to vector<16x128xf32>
    %9 = arith.subf %8, %7 : vector<16x128xf32>
    %cst_7 = arith.constant dense<0x7F800000> : vector<128xf32>
    %10 = vector.multi_reduction <minimumf>, %9, %cst_7 [0] : vector<16x128xf32> to vector<128xf32>
    %11 = vector.shape_cast %10 : vector<128xf32> to vector<1x128xf32>
    %12 = tpu.iota {dimensions = array<i32: 0>} : vector<16x128xi32>
    %13 = vector.broadcast %11 : vector<1x128xf32> to vector<16x128xf32>
    %14 = arith.cmpf oeq, %9, %13 : vector<16x128xf32>
    %c16_i32 = arith.constant 16 : i32
    %15 = vector.broadcast %c16_i32 : i32 to vector<16x128xi32>
    %16 = arith.select %14, %12, %15 : vector<16x128xi1>, vector<16x128xi32>
    %cst_8 = arith.constant dense<2147483647> : vector<128xi32>
    %17 = vector.multi_reduction <minsi>, %16, %cst_8 [0] : vector<16x128xi32> to vector<128xi32>
    %18 = vector.shape_cast %17 : vector<128xi32> to vector<1x128xi32>
    %19 = vector.broadcast %18 : vector<1x128xi32> to vector<16x128xi32>
    %20 = arith.cmpi eq, %16, %19 : vector<16x128xi32>
    %21 = arith.extui %20 : vector<16x128xi1> to vector<16x128xi32>
    %22 = arith.sitofp %21 : vector<16x128xi32> to vector<16x128xf32>
    %c0_9 = arith.constant 0 : index
    %c0_10 = arith.constant 0 : index
    %23 = vector.load %arg4[%c0_9, %c0_10] : memref<16x32xf32, #tpu.memory_space<vmem>>, vector<16x32xf32>
    %cst_11 = arith.constant dense<0.000000e+00> : vector<32x128xf32>
    %24 = tpu.matmul %23, %22, %cst_11 {dimension_numbers = #tpu.dot_dimension_numbers<[0], [0], [1], [1], [0, 1, 1, 1], [], []>} : vector<16x32xf32>, vector<16x128xf32>, vector<32x128xf32> -> vector<32x128xf32>
    %c0_12 = arith.constant 0 : index
    %c0_13 = arith.constant 0 : index
    %c0_14 = arith.constant 0 : index
    %25 = vector.load %arg6[%c0_12, %c0_13, %c0_14] : memref<1x1x128xi32, #tpu.memory_space<vmem>>, vector<1x1x128xi32>
    %26 = vector.shape_cast %25 : vector<1x1x128xi32> to vector<1x128xi32>
    %27 = vector.shape_cast %18 : vector<1x128xi32> to vector<1x1x128xi32>
    tpu.vector_store %arg6[%c0_12, %c0_13, %c0_14], %27 {strides = array<i32>} : memref<1x1x128xi32, #tpu.memory_space<vmem>>, vector<1x1x128xi32>,
    %c0_15 = arith.constant 0 : index
    %c0_16 = arith.constant 0 : index
    %c0_17 = arith.constant 0 : index
    %28 = vector.load %arg7[%c0_15, %c0_16, %c0_17] : memref<1x32x128xf32, #tpu.memory_space<vmem>>, vector<1x32x128xf32>
    %29 = vector.shape_cast %28 : vector<1x32x128xf32> to vector<32x128xf32>
    %30 = vector.shape_cast %24 : vector<32x128xf32> to vector<1x32x128xf32>
    tpu.vector_store %arg7[%c0_15, %c0_16, %c0_17], %30 {strides = array<i32>} : memref<1x32x128xf32, #tpu.memory_space<vmem>>, vector<1x32x128xf32>,
    %31 = arith.mulf %1, %1 : vector<32x128xf32>
    %cst_18 = arith.constant dense<0.000000e+00> : vector<128xf32>
    %32 = vector.multi_reduction <add>, %31, %cst_18 [0] : vector<32x128xf32> to vector<128xf32>
    %33 = vector.shape_cast %32 : vector<128xf32> to vector<1x128xf32>
    %34 = arith.addf %11, %33 : vector<1x128xf32>
    %35 = vector.shape_cast %34 : vector<1x128xf32> to vector<1x1x128xf32>
    %cst_19 = arith.constant dense<0.000000e+00> : vector<1xf32>
    %36 = vector.multi_reduction <add>, %35, %cst_19 [1, 2] : vector<1x1x128xf32> to vector<1xf32>
    %37 = vector.shape_cast %36 : vector<1xf32> to vector<1x1x1xf32>
    %38 = vector.extract %37[0, 0, 0] : f32 from vector<1x1x1xf32>
    %39 = vector.shape_cast %1 : vector<32x128xf32> to vector<1x32x128xf32>
    %cst_20 = arith.constant dense<0.000000e+00> : vector<1xf32>
    %40 = vector.multi_reduction <add>, %39, %cst_20 [1, 2] : vector<1x32x128xf32> to vector<1xf32>
    %41 = vector.shape_cast %40 : vector<1xf32> to vector<1x1x1xf32>
    %42 = vector.extract %41[0, 0, 0] : f32 from vector<1x1x1xf32>
    %43 = vector.shape_cast %33 : vector<1x128xf32> to vector<1x1x128xf32>
    %cst_21 = arith.constant dense<0.000000e+00> : vector<1xf32>
    %44 = vector.multi_reduction <add>, %43, %cst_21 [1, 2] : vector<1x1x128xf32> to vector<1xf32>
    %45 = vector.shape_cast %44 : vector<1xf32> to vector<1x1x1xf32>
    %46 = vector.extract %45[0, 0, 0] : f32 from vector<1x1x1xf32>
    %47 = tpu.iota {dimensions = array<i32: 3>} : vector<1x1x1x128xi32>
    %c0_i32 = arith.constant 0 : i32
    %48 = vector.broadcast %c0_i32 : i32 to vector<1x1x1x128xi32>
    %49 = arith.cmpi eq, %47, %48 : vector<1x1x1x128xi32>
    %cst_22 = arith.constant 0.000000e+00 : f32
    %50 = vector.broadcast %38 : f32 to vector<1x1x1x128xf32>
    %51 = vector.broadcast %cst_22 : f32 to vector<1x1x1x128xf32>
    %52 = arith.select %49, %50, %51 : vector<1x1x1x128xi1>, vector<1x1x1x128xf32>
    %c1_i32 = arith.constant 1 : i32
    %53 = vector.broadcast %c1_i32 : i32 to vector<1x1x1x128xi32>
    %54 = arith.cmpi eq, %47, %53 : vector<1x1x1x128xi32>
    %cst_23 = arith.constant 0.000000e+00 : f32
    %55 = vector.broadcast %42 : f32 to vector<1x1x1x128xf32>
    %56 = vector.broadcast %cst_23 : f32 to vector<1x1x1x128xf32>
    %57 = arith.select %54, %55, %56 : vector<1x1x1x128xi1>, vector<1x1x1x128xf32>
    %58 = arith.addf %52, %57 : vector<1x1x1x128xf32>
    %c2_i32 = arith.constant 2 : i32
    %59 = vector.broadcast %c2_i32 : i32 to vector<1x1x1x128xi32>
    %60 = arith.cmpi eq, %47, %59 : vector<1x1x1x128xi32>
    %cst_24 = arith.constant 0.000000e+00 : f32
    %61 = vector.broadcast %46 : f32 to vector<1x1x1x128xf32>
    %62 = vector.broadcast %cst_24 : f32 to vector<1x1x1x128xf32>
    %63 = arith.select %60, %61, %62 : vector<1x1x1x128xi1>, vector<1x1x1x128xf32>
    %64 = arith.addf %58, %63 : vector<1x1x1x128xf32>
    %c0_25 = arith.constant 0 : index
    %c0_26 = arith.constant 0 : index
    %c0_27 = arith.constant 0 : index
    %c0_28 = arith.constant 0 : index
    %65 = vector.load %arg8[%c0_25, %c0_26, %c0_27, %c0_28] : memref<1x1x1x128xf32, #tpu.memory_space<vmem>>, vector<1x1x1x128xf32>
    tpu.vector_store %arg8[%c0_25, %c0_26, %c0_27, %c0_28], %64 {strides = array<i32>} : memref<1x1x1x128xf32, #tpu.memory_space<vmem>>, vector<1x1x1x128xf32>,
    return
  }
  func.func @transform_0(%arg0: i32, %arg1: i32) -> (i32, i32, i32) {
    %c0_i32 = arith.constant 0 : i32
    %c0_i32_0 = arith.constant 0 : i32
    return %arg0, %c0_i32, %arg1 : i32, i32, i32
  }
  func.func @transform_1(%arg0: i32, %arg1: i32) -> (i32, i32) {
    %c0_i32 = arith.constant 0 : i32
    %c0_i32_0 = arith.constant 0 : i32
    %c0_i32_1 = arith.constant 0 : i32
    return %c0_i32, %c0_i32_0 : i32, i32
  }
  func.func @transform_2(%arg0: i32, %arg1: i32) -> (i32, i32) {
    %c0_i32 = arith.constant 0 : i32
    %c0_i32_0 = arith.constant 0 : i32
    %c0_i32_1 = arith.constant 0 : i32
    return %c0_i32, %c0_i32_0 : i32, i32
  }
  func.func @transform_3(%arg0: i32, %arg1: i32) -> (i32, i32) {
    %c0_i32 = arith.constant 0 : i32
    %c0_i32_0 = arith.constant 0 : i32
    %c0_i32_1 = arith.constant 0 : i32
    return %c0_i32, %c0_i32_0 : i32, i32
  }
  func.func @transform_4(%arg0: i32, %arg1: i32) -> (i32, i32, i32) {
    %c0_i32 = arith.constant 0 : i32
    %c0_i32_0 = arith.constant 0 : i32
    return %arg0, %c0_i32, %arg1 : i32, i32, i32
  }
  func.func @transform_5(%arg0: i32, %arg1: i32) -> (i32, i32, i32) {
    %c0_i32 = arith.constant 0 : i32
    %c0_i32_0 = arith.constant 0 : i32
    return %arg0, %c0_i32, %arg1 : i32, i32, i32
  }
  func.func @transform_6(%arg0: i32, %arg1: i32) -> (i32, i32, i32, i32) {
    %c0_i32 = arith.constant 0 : i32
    %c0_i32_0 = arith.constant 0 : i32
    %c0_i32_1 = arith.constant 0 : i32
    return %arg0, %arg1, %c0_i32, %c0_i32_0 : i32, i32, i32, i32
  }
}

</mosaic_0001>

<bundles_post_ra>
// kernel: tpu_custom_call.1
= control target key start
LH: loop header
LB: loop body
LE: loop exit
PB: predicated region body
PF: predicated region fallthrough
CT: control target
= control target key end

     0   :  { %s1505_s0 = inlined_call_operand.hbm [shape: f32[2,32,256], index: 0, kind: input, shape index: {}]   ;;  %s1506_s1 = inlined_call_operand.vmem [shape: bf16[16,32], index: 1, kind: input, shape index: {}]   ;;  %s1507_s2 = inlined_call_operand.vmem [shape: f32[16,32], index: 2, kind: input, shape index: {}]   ;;  %s1508_s3 = inlined_call_operand.vmem [shape: f32[16,1], index: 3, kind: input, shape index: {}]   ;;  %s1509_s4 = inlined_call_operand.hbm [shape: s32[2,1,256], index: 4, kind: output, shape index: {0}]   ;;  %s1510_s5 = inlined_call_operand.hbm [shape: f32[2,32,256], index: 5, kind: output, shape index: {1}]   ;;  %s1511_s6 = inlined_call_operand.hbm [shape: f32[2,2,1,128], index: 6, kind: output, shape index: {2}]  }
   0x1   :  { %1521 = sst [smem:[#allocation15_spill]] %s1510_s5 }
   0x2   :  { %1522 = sst [smem:[#allocation16_spill]] %s1511_s6 }
   0x3   :  { %12 = vsyncpa [#allocation3], 0 }
   0x4   :  { %14 = vsyncpa [#allocation3 + $0x1], 0 }
   0x5   :  { %15 = vsyncpa [#allocation4], 0 }
   0x6   :  { %17 = vsyncpa [#allocation4 + $0x1], 0 }
   0x7   :  { %18 = vsyncpa [#allocation7], 0 }
   0x8   :  { %20 = vsyncpa [#allocation7 + $0x1], 0  ;;  %s1214_s21 = smov 0   ;;  %s1216_s22 = smov 0  }
   0x9   :  { %s1218_s23 = smov 0   ;;  %s1220_s24 = smov 0  }
   0xa   :  { %s1222_s25 = smov 0   ;;  %s1224_s26 = smov 0  }
   0xb   :  { %s1226_s27 = smov 0   ;;  %s1228_s28 = smov 0  }
   0xc LB: > { %1523 = sst [smem:[#allocation12_spill]] %s1135_s21  ;;  %s1255_s29 = sadd.s32 4294967295, %s1163_s28   ;;  %s1163_s28 = sphi %s1228_s28, %s26_s28   ;;  %s1159_s27 = sphi %s1226_s27, %s1548_s27   ;;  %s1155_s26 = sphi %s1224_s26, %s1547_s26   ;;  %s1151_s25 = sphi %s1222_s25, %s1546_s25   ;;  %s1147_s24 = sphi %s1220_s24, %s1545_s24   ;;  %s1143_s23 = sphi %s1218_s23, %s1544_s23   ;;  %s1139_s22 = sphi %s1216_s22, %s1543_s22   ;;  %s1135_s21 = sphi %s1214_s21, %s1542_s21  }
   0xd   : > { %s1517_s30 = sadd.s32 4294967294, %s1163_s28   ;;  %s35_s7 = sadd.s32 1, %s1155_s26 }
   0xe   : > { %s38_s8 = sadd.s32 1, %s1159_s27  ;;  %p36_p0 = scmp.ge.s32.totalorder %s35_s7, 2 }
   0xf   : > { %s47_s9 = sadd.s32 1, %s1143_s23  ;;  %p54_p1 = scmp.ne.s32.totalorder %s1143_s23, %s1139_s22 }
  0x10   : > { %p55_p2 = scmp.eq.s32.totalorder %s1163_s28, 0  ;;  %s1550_s7 = smov (%p36_p0, %s35_s7), 0 }
  0x11   : > { %1524 = sst [smem:[#allocation13_spill]] %s1550_s7  ;;  %s1552_s8 = smov (!%p36_p0, %s38_s8), %s1159_s27 }
  0x12   : > { %s43_s10 = ssub.s32 %s1155_s26, %s1550_s7  ;;  %p1269_p3 = por %p55_p2, %p54_p1 }
  0x13   : > { %p40_p4 = scmp.ge.s32.totalorder %s1552_s8, 2  ;;  %p60_p5 = scmp.ne.s32.totalorder %s1139_s22, %s1135_s21 }
  0x14   : > { %p61_p6 = scmp.eq.s32.totalorder %s1255_s29, 0  ;;  %p149_p7 = scmp.eq.s32.totalorder %s1255_s29, 3 }
  0x15   : > { %s1554_s8 = smov (%p40_p4, %s1552_s8), 0  ;;  %p155_p10 = scmp.eq.s32.totalorder %s1517_s30, 3 }
  0x16   : > { %1526 = sst [smem:[#allocation14_spill]] %s1554_s8  ;;  %p1279_p8 = por %p61_p6, %p60_p5 }
  0x17   : > { %p1283_p9 = por %p149_p7, %p54_p1  ;;  %s42_s14 = ssub.s32 %s1159_s27, %s1554_s8 }
  0x18   : > { %s44_s15 = sor.u32 %s43_s10, %s42_s14  ;;  %p1291_p12 = por %p155_p10, %p60_p5 }
  0x19   : > { %s1528_s13 = scalar_select %p1283_p9, 1, 0 }
  0x1a   : > { %p45_p11 = scmp.eq.s32.totalorder %s44_s15, 0  ;;  %p897_p13 = scmp.lt.s32.totalorder %s1163_s28, 4 }
  0x1b   : > { %s1529_s16 = scalar_select %p1291_p12, 1, 0 }
  0x1c   : > { %s240_s17 = sand.u32 1, %s1143_s23   ;;  %s814_s20 = sshll.u32 %s1159_s27, 3 }
  0x1d   : > { %s1298_s18 = scalar_select %p45_p11, %s1143_s23, %s47_s9  }
  0x1e   : > { %s813_s19 = sshll.u32 %s240_s17, 5  ;;  %s249_s7 = sadd.s32 %s1155_s26, %s814_s20 }
  0x1f   : > { %s244_s21 = scalar_lea.vmem [#allocation2], %s813_s19  ;;  %s815_s5 = sshll.u32 %s249_s7, 7 }
  0x20   : > { %s252_s6 = sshll.u32 %s244_s21, 4  ;;  %s1307_s10 = scalar_lea.hbm %s1505_s0, %s815_s5  ;;  %s1302_s6 = int_to_ptr.vmem [resolvable:$true] %s252_s6 }
  0x21   : > { %p1311_p0 = pnand %p897_p13, %p1269_p3  ;;  %s1315_s21 = scalar_lea.sflag [#allocation3], %s240_s17 }
  0x22   : > { %s975_s7 = scalar_lea.hbm %s1307_s10, 512  ;;  %s980_s8 = scalar_lea.hbm %s1505_s0, 2048 }
  0x23   : > { %p976_p1 = scmp.ne.s32.totalorder %s1307_s10, %s975_s7  ;;  %p977_p2 = pneg %p1311_p0 }
  0x24   : > { %p981_p3 = scmp.lt.u32.totalorder %s1307_s10, %s1505_s0  ;;  %p982_p6 = scmp.lt.u32.totalorder %s980_s8, %s975_s7 }
  0x25   : > { %p978_p4 = pnand %p977_p2, %p976_p1  ;;  %p984_p10 = scmp.lt.u32.totalorder %s975_s7, %s1307_s10 }
  0x26   : > { %p983_p7 = por %p982_p6, %p981_p3 }
  0x27   : > { %p979_p5 = pneg %p978_p4 }
  0x28   : > { %p985_p11 = por %p984_p10, %p983_p7 }
  0x2a   : > { %p986_p13 = pnand %p985_p11, %p979_p5 }
  0x2c   : > { %989 = shalt.err (!%p986_p13)
}
  0x2d   : > { %s990_s15 = scalar_lea.vmem %s1302_s6, 512  ;;  %s1165_s17 = smov [#allocation2]  }
  0x2e   : > { %p991_p1 = scmp.ne.s32.totalorder %s1302_s6, %s990_s15  ;;  %s995_s19 = sshll.u32 %s1165_s17, 4  ;;  %s996_s19 = int_to_ptr.vmem [resolvable:$false] %s995_s19 }
  0x2f   : > { %s997_s20 = scalar_lea.vmem %s996_s19, 1024  ;;  %p998_p9 = scmp.lt.s32.totalorder %s1302_s6, %s996_s19 }
  0x30   : > { %p993_p4 = pnand %p991_p1, %p977_p2  ;;  %p999_p3 = scmp.lt.s32.totalorder %s997_s20, %s990_s15 }
  0x32   : > { %p994_p12 = pneg %p993_p4  ;;  %p1000_p6 = por %p999_p3, %p998_p9 }
  0x34   : > { %p1001_p7 = pnand %p1000_p6, %p994_p12 }
  0x36   : > { %1004 = shalt.err (!%p1001_p7)
}
  0x37   : > { %s1166_s7 = smov 256   ;;  %s1167_s5 = smov 128  }
  0x38   : > { %s1168_s30 = smov 8   ;;  %p816_p2 = scmp.ge.s32.totalorder %s1163_s28, 1 }
  0x39   : > { %886 = dma.hbm_to_vmem [thread:$0]  (!%p1311_p0), %s1307_s10, 512, %s1302_s6, %s1315_s21, %s1166_s7, %s1167_s5, %s1168_s30  }
  0x3a   : > { %p260_p5 = scmp.lt.s32.totalorder %s1163_s28, 5 }
  0x3c   : > { %p261_p10 = pnand %p816_p2, %p260_p5 }
  0x3d   : > { %s1346_s8 = sand.u32 (!%p261_p10), 1, %s1139_s22  }
  0x3e   : > { %264 = sbr.rel (%p261_p10) target bundleno = 589 (0x24d), region = 36  ;;  %s1520_s11 = sshll.u32 (!%p261_p10), %s1346_s8, 5 }
  0x3f   : > { %s267_s14 = scalar_lea.sflag (!%p261_p10), [#allocation3], %s1346_s8  ;;  %s270_s15 = scalar_lea.vmem (!%p261_p10), [#allocation2], %s1520_s11 }
  0x45   : > { %1122 = dma.done.wait (%p1279_p8), %s267_s14, 512  }
  0x46   : > { %1124 = vsyncadd (%p1279_p8), %s267_s14, 4294966784  ;;  %v1169_v0 = vmov 0.0   ;;  %vm1170_vm0 = vmmov 0   ;;  %v1171_v1 = vmov 0   ;;  %v308_v2 = vld [vmem:[%s270_s15] sm:$0xff]  ;;  %v309_v3 = vld [vmem:[%s270_s15 + $0x8] sm:$0xff]  ;;  %v389_v40 = vlaneseq }
  0x47   : > { %847 = vmatprep.subr.bf16.mxu0 %v1169_v0  ;;  %851 = vmatprep.mubr.msk.bf16.mxu0 %vm1170_vm0, %v1169_v0  ;;  %v310_v4 = vld [vmem:[%s270_s15 + $0x10] sm:$0xff]  ;;  %v312_v5 = vpack.c.bf16 %v309_v3, %v308_v2  ;;  %v311_v6 = vld [vmem:[%s270_s15 + $0x18] sm:$0xff]  ;;  %v366_v7 = vld [vmem:[%s1508_s3] sm:$0xff]  ;;  %vm321_vm1 = vcmask 261120   ;;  %v575_v13 = vadd.f32 %v309_v3, %v308_v2  ;;  %vm447_vm2 = vcmask 130048   ;;  %s293_s30 = scalar_lea.vmem [#allocation5], %s1346_s8 }
  0x48   : > { %973 = vset.pattern.permute.xlu0 %v1171_v1  ;;  %v313_v8 = vpack.c.bf16 %v311_v6, %v310_v4  ;;  %v413_v9 = vld [vmem:[%s1507_s2] sm:$0xff]  ;;  %v367_v10 = vld [vmem:[%s1508_s3 + $0x8] sm:$0xff]  ;;  %v550_v17 = vmul.f32 %v308_v2, %v308_v2  ;;  %v551_v18 = vmul.f32 %v309_v3, %v309_v3  ;;  %v552_v20 = vmul.f32 %v310_v4, %v310_v4  ;;  %s830_s14 = sshll.u32 %s1151_s25, 1  ;;  %s635_s6 = sshll.u32 %s293_s30, 4  ;;  %s1382_s6 = int_to_ptr.vmem [resolvable:$true] %s635_s6 }
  0x49   : > { %848 = vmatpush3.bf16.msra.mxu0 %v312_v5  ;;  %372 = vperm.xlu0 %973, %v366_v7   ;;  %v414_v11 = vld [vmem:[%s1507_s2 + $0x8] sm:$0xff]  ;;  %v974_v12 = vld [vmem:[%s1506_s1] sm:$0xff]   ;;  %v576_v14 = vadd.f32 %v575_v13, %v310_v4  ;;  %v553_v21 = vmul.f32 %v311_v6, %v311_v6  ;;  %v390_v44 = vshrl.u32 %v389_v40, 7  ;;  %vm564_vm3 = vcmask 1040384   ;;  %s1379_s15 = sadd.s32 %s1147_s24, %s830_s14  ;;  %s612_s17 = scalar_lea.sflag [#allocation4], %s1346_s8 }
  0x4a   : > { %849 = vmatprep.subr.bf16.mxu0 %v1169_v0  ;;  %415 = vxpose.xlu1.b32.start [1/2] (short) (narrow) %v413_v9, 32  ;;  %v554_v19 = vadd.f32 %v551_v18, %v550_v17  ;;  %v1172_v0 = vmov 1.0|1.0   ;;  %s1519_s10 = sshll.u32 %s1379_s15, 4  ;;  %s1005_s19 = scalar_lea.vmem %s1382_s6, 16 }
  0x4b   : > { %v577_v15 = vadd.f32 %v576_v14, %v311_v6  ;;  %v391_v48 = vadd.s32 8, %v390_v44  ;;  %s633_s21 = scalar_lea.hbm %s1509_s4, %s1519_s10  ;;  %p1006_p8 = scmp.ne.s32.totalorder %s1382_s6, %s1005_s19 }
  0x4c   : > { %v555_v22 = vadd.f32 %v554_v19, %v552_v20  ;;  %p1531_p9 = scmp.ne.s32.totalorder %s1528_s13, 0  ;;  %s1173_s20 = smov [#allocation5]  }
  0x4d   : > { %850 = vmatpush3.bf16.msra.mxu0 %v313_v8  ;;  %377 = vperm.xlu0 %973, %v367_v10   ;;  %s1009_s7 = sshll.u32 %s1173_s20, 4  ;;  %s1010_s7 = int_to_ptr.vmem [resolvable:$false] %s1009_s7 }
  0x4e   : > { %416 = vxpose.xlu1.b32.end [2/2] (short) (narrow) %v414_v11, 32  ;;  %v556_v23 = vadd.f32 %v555_v22, %v553_v21  ;;  %p1007_p12 = pnand %p1006_p8, %p1531_p9  ;;  %s1011_s5 = scalar_lea.vmem %s1010_s7, 32 }
  0x4f   : > { %p1012_p11 = scmp.lt.s32.totalorder %s1382_s6, %s1010_s7  ;;  %p1013_p13 = scmp.lt.s32.totalorder %s1011_s5, %s1005_s19 }
  0x50   : > { %852 = vmatmul.mubr.msk.bf16.vlgmr.msra.gmra.mrb[0].mxu0 %vm321_vm1, %v974_v12  ;;  %v557_v24 = vrot.slane %v556_v23, 4  ;;  %p1008_p0 = pneg %p1007_p12 }
  0x51   : > { %p1014_p1 = por %p1013_p13, %p1012_p11 }
  0x52   : > { %v558_v29 = vadd.f32 %v557_v24, %v556_v23 }
  0x53   : > { %p1015_p4 = pnand %p1014_p1, %p1008_p0 }
  0x54   : > { %v559_v36 = vrot.slane %v558_v29, 2 }
  0x56   : > { %v560_v39 = vadd.f32 %v559_v36, %v558_v29 }
  0x58   : > { %v561_v43 = vrot.slane %v560_v39, 1 }
  0x5a   : > { %v562_v47 = vadd.f32 %v561_v43, %v560_v39 }
  0x5c   : > { %v587_v55 = vsel %vm564_vm3, %v562_v47, 0.0 }
  0x7d   : > { %578 = vadd.xlane.f32.xlu1 %v577_v15 }
  0xc8   : > { %v373_v25 = vpop.permute.xlu0 %372 }
  0xca   : > { %v431_v16 = vpop.trf.xlu1 }
  0xcb   : > { %859 = vmatprep.mubr.msk.f32.mxu1 %vm447_vm2, %v431_v16 }
  0xcc   : > { %v378_v33 = vpop.permute.xlu0 %377 }
  0xce   : > { %v432_v59 = vpop.trf.xlu1 }
  0xd2   : > { %v433_v63 = vpop.trf.xlu1 }
  0xd6   : > { %v434_v1 = vpop.trf.xlu1 }
 0x123   : > { %v359_v26 = vpop.f32.mrb[0].mxu0 }
 0x124   : > { %v368_v27 = vmul.f32 2.0, %v359_v26  ;;  %v853_v28 = vpop.f32.mrb[1].mxu0 }
 0x125   : > { %v362_v30 = vpop.f32.mrb[2].mxu0 }
 0x126   : > { %v369_v31 = vmul.f32 2.0, %v362_v30  ;;  %v854_v32 = vpop.f32.mrb[3].mxu0  ;;  %v380_v34 = vsub.f32 %v373_v25, %v368_v27 }
 0x128   : > { %v381_v35 = vsub.f32 %v378_v33, %v369_v31 }
 0x12a   : > { %v382_v37 = vmin.f32 %v380_v34, %v381_v35 }
 0x12c   : > { %v383_v38 = vrot.slane %v382_v37, 4 }
 0x12e   : > { %v384_v41 = vmin.f32 %v382_v37, %v383_v38 }
 0x130   : > { %v385_v42 = vrot.slane %v384_v41, 2 }
 0x132   : > { %v386_v45 = vmin.f32 %v384_v41, %v385_v42 }
 0x134   : > { %v387_v46 = vrot.slane %v386_v45, 1 }
 0x136   : > { %v388_v49 = vmin.f32 %v386_v45, %v387_v46 }
 0x138   : > { %vm393_vm4 = vcmp.eq.f32.partialorder %v381_v35, %v388_v49  ;;  %v563_v50 = vadd.f32 %v562_v47, %v388_v49  ;;  %vm392_vm5 = vcmp.eq.f32.partialorder %v380_v34, %v388_v49 }
 0x139   : > { %v394_v51 = vsel %vm392_vm5, %v390_v44, 16  ;;  %v395_v52 = vsel %vm393_vm4, %v391_v48, 16 }
 0x13a   : > { %v565_v53 = vsel %vm564_vm3, %v563_v50, 0.0  ;;  %vm396_vm6 = vcmp.lt.s32.totalorder %v394_v51, %v395_v52 }
 0x13b   : > { %566 = vadd.xlane.f32.xlu0 %v565_v53  ;;  %v397_v54 = vsel %vm396_vm6, %v394_v51, %v395_v52 }
 0x13c   : > { %v398_v56 = vrot.slane %v397_v54, 4 }
 0x13e   : > { %vm399_vm7 = vcmp.lt.s32.totalorder %v397_v54, %v398_v56 }
 0x13f   : > { %588 = vadd.xlane.f32.xlu0 %v587_v55  ;;  %v400_v57 = vsel %vm399_vm7, %v397_v54, %v398_v56 }
 0x140   : > { %v401_v58 = vrot.slane %v400_v57, 2 }
 0x142   : > { %vm402_vm8 = vcmp.lt.s32.totalorder %v400_v57, %v401_v58 }
 0x143   : > { %v403_v60 = vsel %vm402_vm8, %v400_v57, %v401_v58 }
 0x144   : > { %v404_v61 = vrot.slane %v403_v60, 1 }
 0x146   : > { %vm405_vm9 = vcmp.lt.s32.totalorder %v403_v60, %v404_v61 }
 0x147   : > { %v406_v62 = vsel %vm405_vm9, %v403_v60, %v404_v61 }
 0x148   : > { %vm407_vm10 = vcmp.eq.s32.totalorder %v394_v51, %v406_v62  ;;  %vm408_vm11 = vcmp.eq.s32.totalorder %v395_v52, %v406_v62  ;;  %545 = vst [vmem:[%s293_s30] sm:$0x1] %v406_v62 }
 0x149   : > { %vm865_vm12 = vmpackc.low %vm408_vm11, %vm407_vm10 }
 0x14a   : > { %866 = vmatprep.subr.msk.bf16.mxu1 %vm865_vm12, %v1172_v0 }
 0x14b   : > { %868 = vmatpush3.bf16.msk.msra.mxu1 %vm865_vm12, %v1172_v0 }
 0x14e   : > { %860 = vmatmul.mubr.msk.f32.vlgmr.msra.gmra.mrb[0].mxu1 %vm447_vm2, %v432_v59 }
 0x14f   : > { %862 = vmatprep.mubr.msk.f32.mxu1 %vm447_vm2, %v433_v63 }
 0x152   : > { %863 = vmatmul.mubr.msk.f32.gmra.mrb[2].mxu1 %vm447_vm2, %v434_v1 }
 0x153   : > { %1018 = shalt.err (!%p1015_p4)
}
 0x154   : > { %s1019_s30 = scalar_lea.hbm %s633_s21, 16  ;;  %s1023_s9 = scalar_lea.hbm %s1509_s4, 64 }
 0x155   : > { %p1020_p3 = scmp.ne.s32.totalorder %s633_s21, %s1019_s30  ;;  %p1024_p2 = scmp.lt.u32.totalorder %s633_s21, %s1509_s4 }
 0x156   : > { %p1025_p5 = scmp.lt.u32.totalorder %s1023_s9, %s1019_s30  ;;  %p1027_p8 = scmp.lt.u32.totalorder %s1019_s30, %s633_s21 }
 0x157   : > { %p1021_p6 = pnand %p1020_p3, %p1531_p9 }
 0x158   : > { %p1026_p10 = por %p1025_p5, %p1024_p2 }
 0x159   : > { %p1022_p7 = pneg %p1021_p6 }
 0x15a   : > { %p1028_p12 = por %p1027_p8, %p1026_p10 }
 0x15c   : > { %p1029_p0 = pnand %p1028_p12, %p1022_p7 }
 0x15e   : > { %1032 = shalt.err (!%p1029_p0)
}
 0x15f   : > { %877 = dma.vmem_to_hbm [thread:$0]  (%p1531_p9), %s1382_s6, 16, %s633_s21, %s612_s17   ;;  %v579_v2 = vpop.xlane.xlu1 %578  ;;  %v598_v23 = vand.u32 127, %v389_v40 }
 0x160   : > { %v580_v3 = vrot.slane %v579_v2, 4  ;;  %s306_s21 = scalar_lea.vmem [#allocation8], %s1346_s8  ;;  %s832_s17 = sshll.u32 %s1151_s25, 3 }
 0x161   : > { %vm599_vm13 = vcmp.eq.s32.totalorder %v598_v23, 0  ;;  %vm602_vm14 = vcmp.eq.s32.totalorder %v598_v23, 1  ;;  %vm606_vm15 = vcmp.eq.s32.totalorder %v598_v23, 2  ;;  %s646_s19 = sadd.s32 %s1147_s24, %s832_s17  ;;  %s1532_s20 = sshll.u32 %s1346_s8, 5 }
 0x162   : > { %v581_v4 = vadd.f32 %v580_v3, %v579_v2  ;;  %s300_s7 = scalar_lea.vmem [#allocation6], %s1532_s20  ;;  %s615_s30 = sand.u32 1, %s1255_s29  }
 0x163   : > { %s649_s5 = sshll.u32 %s300_s7, 4  ;;  %s833_s14 = sshll.u32 %s646_s19, 7  ;;  %s1413_s5 = int_to_ptr.vmem [resolvable:$true] %s649_s5 }
 0x164   : > { %v582_v5 = vrot.slane %v581_v4, 2  ;;  %s667_s12 = sshll.u32 %s306_s21, 4  ;;  %s1533_s25 = sld [smem:[#allocation15_spill]]  ;;  %s1427_s12 = int_to_ptr.vmem [resolvable:$true] %s667_s12 }
 0x165   : > { %s1535_s24 = sshll.u32 %s1379_s15, 4  ;;  %s1536_s17 = sld [smem:[#allocation16_spill]] }
 0x166   : > { %v583_v8 = vadd.f32 %v582_v5, %v581_v4  ;;  %s1429_s20 = scalar_lea.sflag [#allocation7], %s615_s30 }
 0x168   : > { %v584_v13 = vrot.slane %v583_v8, 1 }
 0x16a   : > { %v585_v18 = vadd.f32 %v584_v13, %v583_v8 }
 0x16b   : > { %s1425_s19 = scalar_lea.hbm %s1536_s17, %s1535_s24 }
 0x1c8   : > { %v567_v6 = vpop.xlane.xlu0 %566 }
 0x1c9   : > { %v568_v7 = vrot.slane %v567_v6, 4 }
 0x1cb   : > { %v569_v9 = vadd.f32 %v568_v7, %v567_v6 }
 0x1cc   : > { %v589_v10 = vpop.xlane.xlu0 %588 }
 0x1cd   : > { %v570_v11 = vrot.slane %v569_v9, 2  ;;  %v590_v12 = vrot.slane %v589_v10, 4 }
 0x1cf   : > { %v591_v14 = vadd.f32 %v590_v12, %v589_v10  ;;  %v571_v15 = vadd.f32 %v570_v11, %v569_v9 }
 0x1d1   : > { %v592_v16 = vrot.slane %v591_v14, 2  ;;  %v572_v17 = vrot.slane %v571_v15, 1 }
 0x1d3   : > { %v593_v19 = vadd.f32 %v592_v16, %v591_v14  ;;  %v573_v20 = vadd.f32 %v572_v17, %v571_v15 }
 0x1d5   : > { %869 = vpush %v573_v20  ;;  %v594_v21 = vrot.slane %v593_v19, 1 }
 0x1d6   : > { %871 = vpush %v585_v18 }
 0x1d7   : > { %v595_v22 = vadd.f32 %v594_v21, %v593_v19 }
 0x1d9   : > { %873 = vpush %v595_v22 }
 0x206   : > { %s870_s11 = spop %869 }
 0x207   : > { %v600_v24 = vstv %s870_s11  ;;  %s872_s6 = spop %871 }
 0x208   : > { %v601_v25 = vsel %vm599_vm13, %v600_v24, 0.0  ;;  %v603_v26 = vstv %s872_s6  ;;  %s1534_s6 = smov %s1533_s25 }
 0x209   : > { %v604_v27 = vsel %vm602_vm14, %v603_v26, 0.0 }
 0x20a   : > { %s874_s10 = spop %873  ;;  %v605_v28 = vadd.f32 %v604_v27, %v601_v25 }
 0x20b   : > { %v607_v29 = vstv %s874_s10  ;;  %s1418_s10 = scalar_lea.hbm %s1533_s25, %s833_s14  ;;  %s1174_s14 = smov [#allocation6]  }
 0x20c   : > { %v608_v30 = vsel %vm606_vm15, %v607_v29, 0.0  ;;  %s1037_s9 = sshll.u32 %s1174_s14, 4  ;;  %s1038_s9 = int_to_ptr.vmem [resolvable:$false] %s1037_s9 }
 0x20d   : > { %v609_v31 = vadd.f32 %v608_v30, %v605_v28  ;;  %s1039_s11 = scalar_lea.vmem %s1038_s9, 1024  ;;  %p1040_p4 = scmp.lt.s32.totalorder %s1413_s5, %s1038_s9 }
 0x20f   : > { %610 = vst [vmem:[%s306_s21] sm:$0x1] %v609_v31  ;;  %s1033_s21 = scalar_lea.vmem %s1413_s5, 512 }
 0x210   : > { %p1034_p11 = scmp.ne.s32.totalorder %s1413_s5, %s1033_s21  ;;  %p1041_p3 = scmp.lt.s32.totalorder %s1039_s11, %s1033_s21 }
 0x212   : > { %p1035_p13 = pnand %p1034_p11, %p1531_p9  ;;  %p1042_p6 = por %p1041_p3, %p1040_p4 }
 0x214   : > { %p1036_p1 = pneg %p1035_p13 }
 0x216   : > { %p1043_p7 = pnand %p1042_p6, %p1036_p1 }
 0x221   : > { %v861_v32 = vpop.f32.mrb[0].mxu1 }
 0x222   : > { %547 = vst [vmem:[%s300_s7 + $0x8] sm:$0xff] %v861_v32  ;;  %v526_v33 = vpop.f32.mrb[1].mxu1 }
 0x223   : > { %546 = vst [vmem:[%s300_s7] sm:$0xff] %v526_v33 }
 0x225   : > { %v864_v34 = vpop.f32.mrb[2].mxu1 }
 0x226   : > { %549 = vst [vmem:[%s300_s7 + $0x18] sm:$0xff] %v864_v34  ;;  %v536_v35 = vpop.f32.mrb[3].mxu1 }
 0x227   : > { %548 = vst [vmem:[%s300_s7 + $0x10] sm:$0xff] %v536_v35 }
 0x228   : > { %1046 = shalt.err (!%p1043_p7)
}
 0x229   : > { %s1047_s15 = scalar_lea.hbm %s1418_s10, 512  ;;  %s1051_s25 = scalar_lea.hbm %s1534_s6, 2048 }
 0x22a   : > { %p1048_p2 = scmp.ne.s32.totalorder %s1418_s10, %s1047_s15  ;;  %p1052_p8 = scmp.lt.u32.totalorder %s1418_s10, %s1534_s6 }
 0x22b   : > { %p1053_p12 = scmp.lt.u32.totalorder %s1051_s25, %s1047_s15  ;;  %p1055_p11 = scmp.lt.u32.totalorder %s1047_s15, %s1418_s10 }
 0x22c   : > { %p1049_p5 = pnand %p1048_p2, %p1531_p9 }
 0x22d   : > { %p1054_p0 = por %p1053_p12, %p1052_p8 }
 0x22e   : > { %p1050_p10 = pneg %p1049_p5 }
 0x22f   : > { %p1056_p13 = por %p1055_p11, %p1054_p0 }
 0x231   : > { %p1057_p1 = pnand %p1056_p13, %p1050_p10 }
 0x233   : > { %1060 = shalt.err (!%p1057_p1)
}
 0x234   : > { %s1175_s8 = smov 128   ;;  %s1176_s21 = smov 256  }
 0x235   : > { %s1177_s14 = smov 8   ;;  %s1061_s9 = scalar_lea.vmem %s1427_s12, 16 }
 0x236   : > { %878 = dma.vmem_to_hbm [thread:$0]  (%p1531_p9), %s1413_s5, 512, %s1418_s10, %s1429_s20, %s1175_s8, %s1176_s21, %s1177_s14  }
 0x237   : > { %p1062_p4 = scmp.ne.s32.totalorder %s1427_s12, %s1061_s9  ;;  %s1178_s11 = smov [#allocation8]  }
 0x238   : > { %s1065_s15 = sshll.u32 %s1178_s11, 4  ;;  %s1066_s15 = int_to_ptr.vmem [resolvable:$false] %s1065_s15 }
 0x239   : > { %p1063_p3 = pnand %p1062_p4, %p1531_p9  ;;  %s1067_s7 = scalar_lea.vmem %s1066_s15, 32 }
 0x23a   : > { %p1068_p7 = scmp.lt.s32.totalorder %s1427_s12, %s1066_s15  ;;  %p1069_p2 = scmp.lt.s32.totalorder %s1067_s7, %s1061_s9 }
 0x23b   : > { %p1064_p6 = pneg %p1063_p3 }
 0x23c   : > { %p1070_p5 = por %p1069_p2, %p1068_p7 }
 0x23e   : > { %p1071_p10 = pnand %p1070_p5, %p1064_p6 }
 0x240   : > { %1074 = shalt.err (!%p1071_p10)
}
 0x241   : > { %s1075_s5 = scalar_lea.hbm %s1425_s19, 16  ;;  %s1079_s25 = scalar_lea.hbm %s1536_s17, 64 }
 0x242   : > { %p1076_p8 = scmp.ne.s32.totalorder %s1425_s19, %s1075_s5  ;;  %p1080_p11 = scmp.lt.u32.totalorder %s1425_s19, %s1536_s17 }
 0x243   : > { %p1081_p13 = scmp.lt.u32.totalorder %s1079_s25, %s1075_s5  ;;  %p1083_p4 = scmp.lt.u32.totalorder %s1075_s5, %s1425_s19 }
 0x244   : > { %p1077_p12 = pnand %p1076_p8, %p1531_p9 }
 0x245   : > { %p1082_p1 = por %p1081_p13, %p1080_p11 }
 0x246   : > { %p1078_p0 = pneg %p1077_p12 }
 0x247   : > { %p1084_p3 = por %p1083_p4, %p1082_p1 }
 0x249   : > { %p1085_p6 = pnand %p1084_p3, %p1078_p0 }
 0x24b   : > { %1088 = shalt.err (!%p1085_p6)
}
 0x24c   : > { %879 = dma.vmem_to_hbm [thread:$0]  (%p1531_p9), %s1427_s12, 16, %s1425_s19, %s1429_s20  }
 0x24d PF: > { %s1537_s8 = sld [smem:[#allocation12_spill]]  ;;  %p898_p7 = scmp.ge.s32.totalorder %s1163_s28, 2 }
 0x24e   : > { %p1538_p2 = scmp.ne.s32.totalorder %s1529_s16, 0 }
 0x250   : > { %p888_p5 = pnand %p898_p7, %p1538_p2 }
 0x253   : > { %s679_s21 = sand.u32 1, %s1537_s8  }
 0x254   : > { %s680_s14 = scalar_lea.sflag [#allocation4], %s679_s21 }
 0x255   : > { %1126 = dma.done.wait (!%p888_p5), %s680_s14, 16  }
 0x256   : > { %1128 = vsyncadd (!%p888_p5), %s680_s14, 4294967280  ;;  %s1539_s9 = sadd.s32 4294967294, %s1163_s28  }
 0x257   : > { %s687_s11 = sand.u32 1, %s1539_s9  }
 0x258   : > { %s688_s15 = scalar_lea.sflag [#allocation7], %s687_s11 }
 0x259   : > { %1130 = dma.done.wait (!%p888_p5), %s688_s15, 528  }
 0x25a   : > { %1132 = vsyncadd (!%p888_p5), %s688_s15, 4294966768  ;;  %s26_s28 = sadd.s32 1, %s1163_s28   ;;  %s1540_s13 = sld [smem:[#allocation13_spill]] }
 0x25b   : > { %p23_p9 = scmp.ge.s32.totalorder %s26_s28, 6   ;;  %s1541_s16 = sld [smem:[#allocation14_spill]] }
 0x25c   : > { %s1542_s21 = smov %s1139_s22  ;;  %s1543_s22 = smov %s1143_s23 }
 0x25d   : > { %s1544_s23 = smov %s1298_s18  ;;  %s1545_s24 = smov %s1155_s26 }
 0x25e   : > { %s1546_s25 = smov %s1159_s27  ;;  %25 = sbr.rel (!%p23_p9) target bundleno = 12 (0xc), region = 113 }
 0x260   : > { %s1547_s26 = smov %s1540_s13 }
 0x261   : > { %s1548_s27 = smov %s1541_s16 }
 0x265   :  { %701 = vsyncpa [#allocation3], 1 }
 0x266   :  { %703 = vsyncpa [#allocation3 + $0x1], 1 }
 0x267   :  { %704 = vsyncpa [#allocation4], 1 }
 0x268   :  { %706 = vsyncpa [#allocation4 + $0x1], 1 }
 0x269   :  { %707 = vsyncpa [#allocation7], 1 }
 0x26a   :  { %709 = vsyncpa [#allocation7 + $0x1], 1 }

</bundles_post_ra>
